<compile_context>
chip_gen: v6e
topology: v6e:2x2x1
jax: 0.10.0
libtpu: 0.0.40
codegen_flags: <defaults>
</compile_context>

<pallas_src>
import functools
import math

import jax
import jax.numpy as jnp
from jax.experimental import pallas as pl
from jax.experimental.pallas import tpu as pltpu


def _ffn_hidden_dim(dim: int, hidden_dim: int, multiple_of: int,
                    ffn_dim_multiplier=None) -> int:
    # Mirrors FeedForward.__init__ hidden_dim arithmetic exactly.
    hidden_dim = int(2 * hidden_dim / 3)
    if ffn_dim_multiplier is not None:
        hidden_dim = int(ffn_dim_multiplier * hidden_dim)
    hidden_dim = multiple_of * ((hidden_dim + multiple_of - 1) // multiple_of)
    return hidden_dim


def _round_up(x: int, m: int) -> int:
    return ((x + m - 1) // m) * m


def _tpu_defaults():
    """Returns (default M tile, VMEM capacity bytes, is_v7x)."""
    kind = ""
    try:
        kind = jax.devices()[0].device_kind.lower()
    except Exception:
        pass
    vmem_cap = None
    try:
        vmem_cap = getattr(pltpu.get_tpu_info(), "vmem_capacity_bytes", None)
    except Exception:
        vmem_cap = None
    if "v5" in kind:
        tm, cap_guess = 256, 128 << 20      # v5e already compute-bound at 256
    elif "v6" in kind:
        tm, cap_guess = 1024, 128 << 20     # v6e crossover ~680 FLOP/byte
    elif "v7" in kind or "7x" in kind:
        tm, cap_guess = 512, 64 << 20       # v7x: 64 MiB VMEM/TC, ~310 FLOP/byte
    else:
        tm, cap_guess = 512, 64 << 20       # conservative default
    is_v7x = ("v7" in kind) or ("7x" in kind)
    return tm, (vmem_cap or cap_guess), is_v7x


def _ffn_kernel(x_ref, w13_ref, w2_ref, o_ref, acc_ref, *, tn):
    """Grid = (M tiles, out-dim tiles, hidden tiles).  Hidden is the reduction.

    x_ref  : (tm, dim)      VMEM, resident across the hidden reduction
    w13_ref: (dim, 2*tn)    VMEM, streamed fused [w1_slice | w3_slice]
    w2_ref : (tn, td)       VMEM, streamed slice of w2
    o_ref  : (tm, td)       VMEM output tile
    acc_ref: (tm, td)       f32 VMEM accumulator scratch
    """
    k = pl.program_id(2)

    @pl.when(k == 0)
    def _init():
        acc_ref[...] = jnp.zeros_like(acc_ref)

    x = x_ref[...]
    # Single MXU pass of x against the fused w1||w3 slice, f32 accumulation.
    h = jnp.dot(x, w13_ref[...], preferred_element_type=jnp.float32)
    h1 = h[:, :tn]           # x @ w1 slice  (tn is a multiple of 128 -> lane-aligned)
    h3 = h[:, tn:]           # x @ w3 slice
    # SwiGLU gating in f32 (sigmoid lowers to the EUP).
    gated = (h1 * jax.nn.sigmoid(h1)) * h3
    # Partial contribution of this hidden slice to the output tile.
    acc_ref[...] += jnp.dot(gated.astype(w2_ref.dtype), w2_ref[...],
                            preferred_element_type=jnp.float32)

    @pl.when(k == pl.num_programs(2) - 1)
    def _finalize():
        o_ref[...] = acc_ref[...].astype(o_ref.dtype)


def feed_forward(x, w1, w3, w2, *, tm=None, tn=None, out_split=None,
                 vmem_limit_bytes=None):
    """x: (batch, seq, dim); w1/w3: (dim, hidden); w2: (hidden, dim)."""
    batch, seq, dim = x.shape
    hidden = w1.shape[1]
    assert w1.shape == (dim, hidden) and w3.shape == (dim, hidden)
    assert w2.shape == (hidden, dim)

    M = batch * seq
    x2 = x.reshape(M, dim)

    tm_default, vmem_cap, is_v7x = _tpu_defaults()

    x_b = x.dtype.itemsize
    w_b = w1.dtype.itemsize
    o_b = x.dtype.itemsize

    # ---- tile selection ----------------------------------------------------
    tm_user = tm is not None
    if tm is None:
        tm = tm_default
    tm = max(16, min(_round_up(tm, 16), _round_up(M, 16)))

    if tn is None:
        tn = 512 if hidden > 512 else _round_up(hidden, 128)
    tn = max(128, _round_up(tn, 128))

    def _footprint(tm_, tn_, td_):
        return (2 * tm_ * dim * x_b            # x tile (double-buffered)
                + 2 * dim * (2 * tn_) * w_b    # fused w1||w3 slice
                + 2 * tn_ * td_ * w_b          # w2 slice
                + 2 * tm_ * td_ * o_b          # output tile
                + tm_ * td_ * 4)               # f32 accumulator

    budget = int(0.80 * vmem_cap)
    while _footprint(tm, tn, dim) > budget:
        if tn > 256 and (tn // 2) % 128 == 0:
            tn //= 2
        elif tm > 256:
            tm = max(256, _round_up(tm // 2, 16))
        else:
            break

    # v7x has 2 TensorCores sharded over the "parallel" axes: make sure the M
    # axis has >= 2 tiles for prefill-size M.
    if is_v7x and not tm_user and M >= 32 and _round_up(M, tm) // tm < 2:
        tm = max(16, _round_up((M + 1) // 2, 16))

    # ---- pad M to a tile multiple (ragged batch*seq support) ---------------
    M_pad = _round_up(M, tm)
    if M_pad != M:
        x2 = jnp.pad(x2, ((0, M_pad - M), (0, 0)))
    n_m = M_pad // tm

    # ---- pad hidden to a multiple of tn and build the fused w1||w3 ---------
    H_pad = _round_up(hidden, tn)
    n_k = H_pad // tn
    w1p = jnp.pad(w1, ((0, 0), (0, H_pad - hidden))) if H_pad != hidden else w1
    w3p = jnp.pad(w3, ((0, 0), (0, H_pad - hidden))) if H_pad != hidden else w3
    # Interleave per hidden tile so block j of width 2*tn is [w1_j | w3_j].
    w13 = jnp.concatenate(
        [w1p.reshape(dim, n_k, tn), w3p.reshape(dim, n_k, tn)], axis=2
    ).reshape(dim, n_k * 2 * tn)
    w2p = jnp.pad(w2, ((0, H_pad - hidden), (0, 0))) if H_pad != hidden else w2

    # ---- optional output-dim split (v7x decode: one M tile -> use both TCs) -
    if out_split is None:
        n_d = 2 if (is_v7x and n_m == 1 and dim % 256 == 0) else 1
    else:
        n_d = int(out_split)
    if n_d > 1:
        assert dim % n_d == 0 and (dim // n_d) % 128 == 0, \
            "output split must keep lane-aligned (128-multiple) tiles"
    td = dim // n_d

    # ---- VMEM limit from the real footprint, generation-aware --------------
    if vmem_limit_bytes is None:
        vmem_limit_bytes = int(min(0.85 * vmem_cap,
                                   max(32 << 20,
                                       _footprint(tm, tn, td) + (4 << 20))))

    # ---- cost estimate (counts per-M-tile weight re-streaming) -------------
    cost = pl.CostEstimate(
        flops=(4 * n_d + 2) * M_pad * dim * H_pad,
        transcendentals=n_d * M_pad * H_pad,
        bytes_accessed=(M_pad * dim * x_b
                        + n_m * n_d * 2 * dim * H_pad * w_b   # w13 per (i, d)
                        + n_m * H_pad * dim * w_b             # w2 per i
                        + M_pad * dim * o_b),
    )

    grid = (n_m, n_d, n_k)

    out2 = pl.pallas_call(
        functools.partial(_ffn_kernel, tn=tn),
        out_shape=jax.ShapeDtypeStruct((M_pad, dim), x.dtype),
        grid_spec=pltpu.PrefetchScalarGridSpec(
            num_scalar_prefetch=0,
            grid=grid,
            in_specs=[
                # x tile: depends only on i -> resident across (d, k).
                pl.BlockSpec((tm, dim), lambda i, d, k: (i, 0)),
                # Fused w1||w3 slice, streamed along the hidden axis.
                pl.BlockSpec((dim, 2 * tn), lambda i, d, k: (0, k)),
                # w2 slice: (hidden tile, output-dim tile).
                pl.BlockSpec((tn, td), lambda i, d, k: (k, d)),
            ],
            out_specs=pl.BlockSpec((tm, td), lambda i, d, k: (i, d)),
            scratch_shapes=[pltpu.VMEM((tm, td), jnp.float32)],
        ),
        compiler_params=pltpu.CompilerParams(
            dimension_semantics=("parallel", "parallel", "arbitrary"),
            vmem_limit_bytes=vmem_limit_bytes,
        ),
        cost_estimate=cost,
    )(x2, w13, w2p)

    if M_pad != M:
        out2 = out2[:M]
    return out2.reshape(batch, seq, dim)


def _kaiming_uniform(key, fan_in, shape, dtype=jnp.float32):
    # kaiming_uniform_(a=sqrt(5)) -> uniform(-b, b), b = sqrt(1/fan_in)
    bound = math.sqrt(1.0 / fan_in)
    return jax.random.uniform(key, shape, dtype=dtype, minval=-bound, maxval=bound)


def _reference(x, w1, w3, w2):
    h1 = x @ w1
    h3 = x @ w3
    return (jax.nn.silu(h1) * h3) @ w2


if __name__ == "__main__":
    key = jax.random.PRNGKey(0)
    kx, k1, k3, k2, kx2, k1b, k3b, k2b = jax.random.split(key, 8)

    # ---- config A: dim=128, hidden=384 (module hidden arithmetic) ----------
    dim = 128
    hidden = _ffn_hidden_dim(dim, 4 * dim, 128)            # -> 384
    batch, seq = 2, 8

    x = jax.random.normal(kx, (batch, seq, dim), dtype=jnp.float32)
    w1 = _kaiming_uniform(k1, dim, (dim, hidden))           # transpose of torch (hidden, dim)
    w3 = _kaiming_uniform(k3, dim, (dim, hidden))
    w2 = _kaiming_uniform(k2, hidden, (hidden, dim))        # transpose of torch (dim, hidden)

    # f32 path (tight tolerance)
    out = jax.block_until_ready(feed_forward(x, w1, w3, w2))
    ref = _reference(x, w1, w3, w2)
    assert out.shape == (batch, seq, dim)
    assert jnp.allclose(out, ref, atol=1e-4, rtol=1e-4), "f32 mismatch vs reference"

    # bf16 path (MXU-throughput config; looser tolerance)
    xb, w1b, w3b, w2b = (a.astype(jnp.bfloat16) for a in (x, w1, w3, w2))
    out_bf16 = jax.block_until_ready(feed_forward(xb, w1b, w3b, w2b))
    ref_bf16 = _reference(*(a.astype(jnp.float32) for a in (xb, w1b, w3b, w2b)))
    assert jnp.allclose(out_bf16.astype(jnp.float32), ref_bf16,
                        atol=5e-2, rtol=5e-2), "bf16 mismatch vs reference"

    # ragged M (batch*seq not a multiple of the tile)
    x_odd = jax.random.normal(kx, (3, 5, dim), dtype=jnp.float32)
    out_odd = jax.block_until_ready(feed_forward(x_odd, w1, w3, w2))
    ref_odd = _reference(x_odd, w1, w3, w2)
    assert jnp.allclose(out_odd, ref_odd, atol=1e-4, rtol=1e-4), "ragged-M mismatch"

    # ---- config B: hidden padding + multi-step reduction + multi M tiles ----
    dim_c = 256
    hidden_c = _ffn_hidden_dim(dim_c, 4 * dim_c, 128)       # -> 768 (pads to 1024 @ tn=512)
    xc = jax.random.normal(kx2, (2, 24, dim_c), dtype=jnp.float32)   # M=48
    w1c = _kaiming_uniform(k1b, dim_c, (dim_c, hidden_c))
    w3c = _kaiming_uniform(k3b, dim_c, (dim_c, hidden_c))
    w2c = _kaiming_uniform(k2b, hidden_c, (hidden_c, dim_c))

    out_c = jax.block_until_ready(feed_forward(xc, w1c, w3c, w2c, tm=16))  # 3 M tiles
    ref_c = _reference(xc, w1c, w3c, w2c)
    assert jnp.allclose(out_c, ref_c, atol=1e-4, rtol=1e-4), "hidden-pad mismatch"

    # ---- config C: forced output-dim split (v7x decode path coverage) ------
    xd = jax.random.normal(kx2, (1, 16, dim_c), dtype=jnp.float32)   # single M tile
    out_d = jax.block_until_ready(feed_forward(xd, w1c, w3c, w2c, out_split=2))
    ref_d = _reference(xd, w1c, w3c, w2c)
    assert jnp.allclose(out_d, ref_d, atol=1e-4, rtol=1e-4), "out-split mismatch"

    print("KERNEL_OK")
</pallas_src>

<mosaic_0001>
module attributes {stable_mosaic.version = 11 : i64} {
  func.func @_ffn_kernel(%arg0: i32, %arg1: i32, %arg2: i32, %arg3: memref<16x128xf32, #tpu.memory_space<vmem>>, %arg4: memref<128x768xf32, #tpu.memory_space<vmem>>, %arg5: memref<384x128xf32, #tpu.memory_space<vmem>>, %arg6: memref<16x128xf32, #tpu.memory_space<vmem>>, %arg7: memref<16x128xf32, #tpu.memory_space<vmem>>) attributes {dimension_semantics = [#tpu.dimension_semantics<parallel>, #tpu.dimension_semantics<parallel>, #tpu.dimension_semantics<arbitrary>], iteration_bounds = array<i64: 1, 1, 1>, scalar_prefetch = 0 : i64, scratch_operands = 1 : i64, tpu.core_type = #tpu.core_type<tc>, window_params = [{transform_indices = @transform_0, window_bounds = array<i64: 16, 128>}, {transform_indices = @transform_1, window_bounds = array<i64: 128, 768>}, {transform_indices = @transform_2, window_bounds = array<i64: 384, 128>}, {transform_indices = @transform_3, window_bounds = array<i64: 16, 128>}]} {
    %c0_i32 = arith.constant 0 : i32
    %0 = arith.cmpi eq, %arg2, %c0_i32 : i32
    %1 = arith.extui %0 : i1 to i32
    %c0_i32_0 = arith.constant 0 : i32
    %2 = arith.cmpi ne, %1, %c0_i32_0 : i32
    scf.if %2 {
      %cst_14 = arith.constant 0.000000e+00 : f32
      %23 = vector.broadcast %cst_14 : f32 to vector<16x128xf32>
      %c0_15 = arith.constant 0 : index
      %c0_16 = arith.constant 0 : index
      %24 = vector.load %arg7[%c0_15, %c0_16] : memref<16x128xf32, #tpu.memory_space<vmem>>, vector<16x128xf32>
      tpu.vector_store %arg7[%c0_15, %c0_16], %23 {strides = array<i32>} : memref<16x128xf32, #tpu.memory_space<vmem>>, vector<16x128xf32>,
    } else {
    }
    %c0 = arith.constant 0 : index
    %c0_1 = arith.constant 0 : index
    %3 = vector.load %arg3[%c0, %c0_1] : memref<16x128xf32, #tpu.memory_space<vmem>>, vector<16x128xf32>
    %c0_2 = arith.constant 0 : index
    %c0_3 = arith.constant 0 : index
    %4 = vector.load %arg4[%c0_2, %c0_3] : memref<128x768xf32, #tpu.memory_space<vmem>>, vector<128x768xf32>
    %cst = arith.constant dense<0.000000e+00> : vector<16x768xf32>
    %5 = tpu.matmul %3, %4, %cst {dimension_numbers = #tpu.dot_dimension_numbers<[1], [0], [0], [1], [0, 0, 1, 1], [], []>} : vector<16x128xf32>, vector<128x768xf32>, vector<16x768xf32> -> vector<16x768xf32>
    %6 = vector.extract_strided_slice %5 {offsets = [0, 0], sizes = [16, 384], strides = [1, 1]} : vector<16x768xf32> to vector<16x384xf32>
    %7 = vector.extract_strided_slice %5 {offsets = [0, 384], sizes = [16, 384], strides = [1, 1]} : vector<16x768xf32> to vector<16x384xf32>
    %8 = arith.negf %6 : vector<16x384xf32>
    %9 = math.exp %8 : vector<16x384xf32>
    %cst_4 = arith.constant 1.000000e+00 : f32
    %10 = vector.broadcast %cst_4 : f32 to vector<16x384xf32>
    %11 = arith.addf %10, %9 : vector<16x384xf32>
    %12 = arith.divf %10, %11 : vector<16x384xf32>
    %13 = arith.mulf %6, %12 : vector<16x384xf32>
    %14 = arith.mulf %13, %7 : vector<16x384xf32>
    %c0_5 = arith.constant 0 : index
    %c0_6 = arith.constant 0 : index
    %15 = vector.load %arg7[%c0_5, %c0_6] : memref<16x128xf32, #tpu.memory_space<vmem>>, vector<16x128xf32>
    %c0_7 = arith.constant 0 : index
    %c0_8 = arith.constant 0 : index
    %16 = vector.load %arg5[%c0_7, %c0_8] : memref<384x128xf32, #tpu.memory_space<vmem>>, vector<384x128xf32>
    %cst_9 = arith.constant dense<0.000000e+00> : vector<16x128xf32>
    %17 = tpu.matmul %14, %16, %cst_9 {dimension_numbers = #tpu.dot_dimension_numbers<[1], [0], [0], [1], [0, 0, 1, 1], [], []>} : vector<16x384xf32>, vector<384x128xf32>, vector<16x128xf32> -> vector<16x128xf32>
    %18 = arith.addf %15, %17 : vector<16x128xf32>
    %c0_10 = arith.constant 0 : index
    %c0_11 = arith.constant 0 : index
    %19 = vector.load %arg7[%c0_10, %c0_11] : memref<16x128xf32, #tpu.memory_space<vmem>>, vector<16x128xf32>
    tpu.vector_store %arg7[%c0_10, %c0_11], %18 {strides = array<i32>} : memref<16x128xf32, #tpu.memory_space<vmem>>, vector<16x128xf32>,
    %c0_i32_12 = arith.constant 0 : i32
    %20 = arith.cmpi eq, %arg2, %c0_i32_12 : i32
    %21 = arith.extui %20 : i1 to i32
    %c0_i32_13 = arith.constant 0 : i32
    %22 = arith.cmpi ne, %21, %c0_i32_13 : i32
    scf.if %22 {
      %c0_14 = arith.constant 0 : index
      %c0_15 = arith.constant 0 : index
      %23 = vector.load %arg7[%c0_14, %c0_15] : memref<16x128xf32, #tpu.memory_space<vmem>>, vector<16x128xf32>
      %c0_16 = arith.constant 0 : index
      %c0_17 = arith.constant 0 : index
      %24 = vector.load %arg6[%c0_16, %c0_17] : memref<16x128xf32, #tpu.memory_space<vmem>>, vector<16x128xf32>
      tpu.vector_store %arg6[%c0_16, %c0_17], %23 {strides = array<i32>} : memref<16x128xf32, #tpu.memory_space<vmem>>, vector<16x128xf32>,
    } else {
    }
    return
  }
  func.func @transform_0(%arg0: i32, %arg1: i32, %arg2: i32) -> (i32, i32) {
    %c0_i32 = arith.constant 0 : i32
    %c0_i32_0 = arith.constant 0 : i32
    return %arg0, %c0_i32 : i32, i32
  }
  func.func @transform_1(%arg0: i32, %arg1: i32, %arg2: i32) -> (i32, i32) {
    %c0_i32 = arith.constant 0 : i32
    %c0_i32_0 = arith.constant 0 : i32
    return %c0_i32, %arg2 : i32, i32
  }
  func.func @transform_2(%arg0: i32, %arg1: i32, %arg2: i32) -> (i32, i32) {
    %c0_i32 = arith.constant 0 : i32
    return %arg2, %arg1 : i32, i32
  }
  func.func @transform_3(%arg0: i32, %arg1: i32, %arg2: i32) -> (i32, i32) {
    %c0_i32 = arith.constant 0 : i32
    return %arg0, %arg1 : i32, i32
  }
}

</mosaic_0001>

<bundles_post_ra>
// kernel: tpu_custom_call.1
= control target key start
LH: loop header
LB: loop body
LE: loop exit
PB: predicated region body
PF: predicated region fallthrough
CT: control target
= control target key end

     0   :  { %8 = vsyncpa [#allocation4], 0  ;;  %s950_s0 = inlined_call_operand.hbm [shape: f32[16,128], index: 0, kind: input, shape index: {}]   ;;  %s951_s1 = inlined_call_operand.hbm [shape: f32[128,768], index: 1, kind: input, shape index: {}]   ;;  %s952_s2 = inlined_call_operand.hbm [shape: f32[384,128], index: 2, kind: input, shape index: {}]   ;;  %s953_s3 = inlined_call_operand.hbm [shape: f32[16,128], index: 3, kind: output, shape index: {}]  }
   0x1   :  { %9 = vsyncpa [#allocation7], 0 }
   0x2   :  { %10 = vsyncpa [#allocation5], 0  ;;  %s884_s12 = smov [#allocation6]  }
   0x3   :  { %s28_s13 = sshll.u32 %s884_s12, 4  ;;  %s29_s13 = int_to_ptr.vmem [resolvable:$true] %s28_s13 }
   0x4   :  { %s806_s14 = scalar_lea.vmem %s29_s13, 12288  ;;  %p811_p1 = scmp.lt.s32.totalorder %s29_s13, %s29_s13 }
   0x5   :  { %p807_p0 = scmp.ne.s32.totalorder %s29_s13, %s806_s14  ;;  %p812_p2 = scmp.lt.s32.totalorder %s806_s14, %s806_s14 }
   0x7   :  { %p813_p3 = por %p812_p2, %p811_p1 }
   0x9   :  { %p814_p4 = pnand %p813_p3, %p807_p0 }
   0xb   :  { %817 = shalt.err (!%p814_p4)
}
   0xc   :  { %s885_s15 = smov 768   ;;  %s886_s16 = smov 48  }
   0xd   :  { %34 = dma.hbm_to_vmem [thread:$0]  %s951_s1, 12288, %s29_s13, [#allocation7], %s885_s15, %s885_s15, %s886_s16  }
   0xe   :  { %s887_s19 = smov [#allocation3]  }
   0xf   :  { %s16_s20 = sshll.u32 %s887_s19, 4  ;;  %s17_s20 = int_to_ptr.vmem [resolvable:$true] %s16_s20 }
  0x10   :  { %s826_s21 = scalar_lea.vmem %s17_s20, 256  ;;  %p831_p6 = scmp.lt.s32.totalorder %s17_s20, %s17_s20 }
  0x11   :  { %p827_p5 = scmp.ne.s32.totalorder %s17_s20, %s826_s21  ;;  %p832_p7 = scmp.lt.s32.totalorder %s826_s21, %s826_s21 }
  0x13   :  { %p833_p8 = por %p832_p7, %p831_p6 }
  0x15   :  { %p834_p9 = pnand %p833_p8, %p827_p5 }
  0x17   :  { %837 = shalt.err (!%p834_p9)
}
  0x18   :  { %s888_s22 = smov 128   ;;  %s889_s23 = smov 8  }
  0x19   :  { %22 = dma.hbm_to_vmem [thread:$0]  %s950_s0, 256, %s17_s20, [#allocation4], %s888_s22, %s888_s22, %s889_s23  }
  0x1a   :  { %s890_s1 = smov [#allocation8]  }
  0x1b   :  { %s40_s26 = sshll.u32 %s890_s1, 4  ;;  %s41_s26 = int_to_ptr.vmem [resolvable:$true] %s40_s26 }
  0x1c   :  { %s846_s27 = scalar_lea.vmem %s41_s26, 6144  ;;  %p851_p11 = scmp.lt.s32.totalorder %s41_s26, %s41_s26 }
  0x1d   :  { %p847_p10 = scmp.ne.s32.totalorder %s41_s26, %s846_s27  ;;  %p852_p12 = scmp.lt.s32.totalorder %s846_s27, %s846_s27 }
  0x1f   :  { %p853_p13 = por %p852_p12, %p851_p11 }
  0x21   :  { %p854_p0 = pnand %p853_p13, %p847_p10 }
  0x23   :  { %857 = shalt.err (!%p854_p0)
}
  0x24   :  { %46 = dma.hbm_to_vmem [thread:$0]  %s952_s2, 6144, %s41_s26, [#allocation7], %s888_s22, %s888_s22, %s889_s23  }
  0x25   :  { %878 = dma.done.wait [#allocation4], 256  }
  0x26   :  { %879 = vsyncadd [#allocation4], 4294967040 }
  0x27   :  { %880 = dma.done.wait [#allocation7], 18432  }
  0x28   :  { %881 = vsyncadd [#allocation7], 4294948864  ;;  %v891_v0 = vmov 0.0   ;;  %v155_v1 = vld [vmem:[#allocation6 + $0x2d8] sm:$0xff]  ;;  %v157_v2 = vld [vmem:[#allocation6 + $0x2e8] sm:$0xff]  ;;  %s892_s0 = smov [#allocation9]  }
  0x29   :  { %224 = vmatprep.mubr.f32.mxu0 %v891_v0  ;;  %301 = vmatprep.mubr.f32.mxu1 %v891_v0  ;;  %v154_v3 = vld [vmem:[#allocation6 + $0x2d0] sm:$0xff]  ;;  %v156_v4 = vld [vmem:[#allocation6 + $0x2e0] sm:$0xff]  ;;  %v149_v5 = vld [vmem:[#allocation6 + $0x2a8] sm:$0xff]  ;;  %s655_s2 = sshll.u32 %s892_s0, 4  ;;  %s656_s2 = int_to_ptr.vmem [resolvable:$true] %s655_s2 }
  0x2a   :  { %160 = vmatprep.subr.mxu0 %v155_v1  ;;  %237 = vmatprep.subr.mxu1 %v157_v2  ;;  %v151_v6 = vld [vmem:[#allocation6 + $0x2b8] sm:$0xff]  ;;  %v148_v7 = vld [vmem:[#allocation6 + $0x2a0] sm:$0xff]  ;;  %v150_v8 = vld [vmem:[#allocation6 + $0x2b0] sm:$0xff]  ;;  %s858_s30 = scalar_lea.vmem %s656_s2, 256  ;;  %p863_p2 = scmp.lt.s32.totalorder %s656_s2, %s656_s2 }
  0x2b   :  { %161 = vmatpush1.msra.mxu0 %v154_v3  ;;  %238 = vmatpush1.msra.mxu1 %v156_v4  ;;  %v143_v9 = vld [vmem:[#allocation6 + $0x278] sm:$0xff]  ;;  %v145_v10 = vld [vmem:[#allocation6 + $0x288] sm:$0xff]  ;;  %v142_v11 = vld [vmem:[#allocation6 + $0x270] sm:$0xff]  ;;  %p859_p1 = scmp.ne.s32.totalorder %s656_s2, %s858_s30  ;;  %p864_p3 = scmp.lt.s32.totalorder %s858_s30, %s858_s30 }
  0x2c   :  { %162 = vmatprep.subr.mxu0 %v149_v5  ;;  %239 = vmatprep.subr.mxu1 %v151_v6  ;;  %v144_v12 = vld [vmem:[#allocation6 + $0x280] sm:$0xff]  ;;  %v137_v13 = vld [vmem:[#allocation6 + $0x248] sm:$0xff]  ;;  %v139_v14 = vld [vmem:[#allocation6 + $0x258] sm:$0xff] }
  0x2d   :  { %163 = vmatpush1.msra.mxu0 %v148_v7  ;;  %240 = vmatpush1.msra.mxu1 %v150_v8  ;;  %v136_v15 = vld [vmem:[#allocation6 + $0x240] sm:$0xff]  ;;  %v138_v16 = vld [vmem:[#allocation6 + $0x250] sm:$0xff]  ;;  %v131_v17 = vld [vmem:[#allocation6 + $0x218] sm:$0xff]  ;;  %p865_p4 = por %p864_p3, %p863_p2 }
  0x2e   :  { %164 = vmatprep.subr.mxu0 %v143_v9  ;;  %241 = vmatprep.subr.mxu1 %v145_v10  ;;  %v133_v18 = vld [vmem:[#allocation6 + $0x228] sm:$0xff]  ;;  %v130_v19 = vld [vmem:[#allocation6 + $0x210] sm:$0xff]  ;;  %v132_v20 = vld [vmem:[#allocation6 + $0x220] sm:$0xff] }
  0x2f   :  { %165 = vmatpush1.msra.mxu0 %v142_v11  ;;  %242 = vmatpush1.msra.mxu1 %v144_v12  ;;  %v125_v21 = vld [vmem:[#allocation6 + $0x1e8] sm:$0xff]  ;;  %v127_v22 = vld [vmem:[#allocation6 + $0x1f8] sm:$0xff]  ;;  %v124_v23 = vld [vmem:[#allocation6 + $0x1e0] sm:$0xff]  ;;  %p866_p5 = pnand %p865_p4, %p859_p1 }
  0x30   :  { %166 = vmatprep.subr.mxu0 %v137_v13  ;;  %243 = vmatprep.subr.mxu1 %v139_v14  ;;  %v126_v24 = vld [vmem:[#allocation6 + $0x1f0] sm:$0xff]  ;;  %v119_v25 = vld [vmem:[#allocation6 + $0x1b8] sm:$0xff]  ;;  %v121_v26 = vld [vmem:[#allocation6 + $0x1c8] sm:$0xff] }
  0x31   :  { %167 = vmatpush1.msra.mxu0 %v136_v15  ;;  %244 = vmatpush1.msra.mxu1 %v138_v16  ;;  %v118_v27 = vld [vmem:[#allocation6 + $0x1b0] sm:$0xff]  ;;  %v120_v28 = vld [vmem:[#allocation6 + $0x1c0] sm:$0xff]  ;;  %v113_v29 = vld [vmem:[#allocation6 + $0x188] sm:$0xff] }
  0x32   :  { %168 = vmatprep.subr.mxu0 %v131_v17  ;;  %245 = vmatprep.subr.mxu1 %v133_v18  ;;  %v115_v30 = vld [vmem:[#allocation6 + $0x198] sm:$0xff]  ;;  %v112_v31 = vld [vmem:[#allocation6 + $0x180] sm:$0xff]  ;;  %v114_v32 = vld [vmem:[#allocation6 + $0x190] sm:$0xff] }
  0x33   :  { %169 = vmatpush1.msra.mxu0 %v130_v19  ;;  %246 = vmatpush1.msra.mxu1 %v132_v20  ;;  %v107_v33 = vld [vmem:[#allocation6 + $0x158] sm:$0xff]  ;;  %v109_v34 = vld [vmem:[#allocation6 + $0x168] sm:$0xff]  ;;  %v106_v35 = vld [vmem:[#allocation6 + $0x150] sm:$0xff] }
  0x34   :  { %170 = vmatprep.subr.mxu0 %v125_v21  ;;  %247 = vmatprep.subr.mxu1 %v127_v22  ;;  %v108_v36 = vld [vmem:[#allocation6 + $0x160] sm:$0xff]  ;;  %v101_v37 = vld [vmem:[#allocation6 + $0x128] sm:$0xff]  ;;  %v103_v38 = vld [vmem:[#allocation6 + $0x138] sm:$0xff] }
  0x35   :  { %171 = vmatpush1.msra.mxu0 %v124_v23  ;;  %248 = vmatpush1.msra.mxu1 %v126_v24  ;;  %v100_v39 = vld [vmem:[#allocation6 + $0x120] sm:$0xff]  ;;  %v102_v40 = vld [vmem:[#allocation6 + $0x130] sm:$0xff]  ;;  %v95_v41 = vld [vmem:[#allocation6 + $0xf8] sm:$0xff] }
  0x36   :  { %172 = vmatprep.subr.mxu0 %v119_v25  ;;  %249 = vmatprep.subr.mxu1 %v121_v26  ;;  %v97_v42 = vld [vmem:[#allocation6 + $0x108] sm:$0xff]  ;;  %v94_v43 = vld [vmem:[#allocation6 + $0xf0] sm:$0xff]  ;;  %v96_v44 = vld [vmem:[#allocation6 + $0x100] sm:$0xff] }
  0x37   :  { %173 = vmatpush1.msra.mxu0 %v118_v27  ;;  %250 = vmatpush1.msra.mxu1 %v120_v28  ;;  %v89_v45 = vld [vmem:[#allocation6 + $0xc8] sm:$0xff]  ;;  %v91_v46 = vld [vmem:[#allocation6 + $0xd8] sm:$0xff]  ;;  %v88_v47 = vld [vmem:[#allocation6 + $0xc0] sm:$0xff] }
  0x38   :  { %174 = vmatprep.subr.mxu0 %v113_v29  ;;  %251 = vmatprep.subr.mxu1 %v115_v30  ;;  %v90_v48 = vld [vmem:[#allocation6 + $0xd0] sm:$0xff]  ;;  %v83_v49 = vld [vmem:[#allocation6 + $0x98] sm:$0xff]  ;;  %v85_v50 = vld [vmem:[#allocation6 + $0xa8] sm:$0xff] }
  0x39   :  { %175 = vmatpush1.msra.mxu0 %v112_v31  ;;  %252 = vmatpush1.msra.mxu1 %v114_v32  ;;  %v82_v51 = vld [vmem:[#allocation6 + $0x90] sm:$0xff]  ;;  %v84_v52 = vld [vmem:[#allocation6 + $0xa0] sm:$0xff]  ;;  %v77_v53 = vld [vmem:[#allocation6 + $0x68] sm:$0xff] }
  0x3a   :  { %176 = vmatprep.subr.mxu0 %v107_v33  ;;  %253 = vmatprep.subr.mxu1 %v109_v34  ;;  %v79_v54 = vld [vmem:[#allocation6 + $0x78] sm:$0xff]  ;;  %v76_v55 = vld [vmem:[#allocation6 + $0x60] sm:$0xff]  ;;  %v78_v56 = vld [vmem:[#allocation6 + $0x70] sm:$0xff] }
  0x3b   :  { %177 = vmatpush1.msra.mxu0 %v106_v35  ;;  %254 = vmatpush1.msra.mxu1 %v108_v36  ;;  %v71_v57 = vld [vmem:[#allocation6 + $0x38] sm:$0xff]  ;;  %v73_v58 = vld [vmem:[#allocation6 + $0x48] sm:$0xff]  ;;  %v70_v59 = vld [vmem:[#allocation6 + $0x30] sm:$0xff] }
  0x3c   :  { %178 = vmatprep.subr.mxu0 %v101_v37  ;;  %255 = vmatprep.subr.mxu1 %v103_v38  ;;  %v72_v60 = vld [vmem:[#allocation6 + $0x40] sm:$0xff]  ;;  %v65_v61 = vld [vmem:[#allocation6 + $0x8] sm:$0xff]  ;;  %v67_v62 = vld [vmem:[#allocation6 + $0x18] sm:$0xff] }
  0x3d   :  { %179 = vmatpush1.msra.mxu0 %v100_v39  ;;  %256 = vmatpush1.msra.mxu1 %v102_v40  ;;  %v64_v63 = vld [vmem:[#allocation6] sm:$0xff]  ;;  %v66_v1 = vld [vmem:[#allocation6 + $0x10] sm:$0xff]  ;;  %v159_v3 = vld [vmem:[#allocation6 + $0x2f8] sm:$0xff] }
  0x3e   :  { %180 = vmatprep.subr.mxu0 %v95_v41  ;;  %257 = vmatprep.subr.mxu1 %v97_v42  ;;  %v930_v2 = vld [vmem:[#allocation3] sm:$0xff]  ;;  %v153_v5 = vld [vmem:[#allocation6 + $0x2c8] sm:$0xff]  ;;  %v152_v6 = vld [vmem:[#allocation6 + $0x2c0] sm:$0xff] }
  0x3f   :  { %181 = vmatpush1.msra.mxu0 %v94_v43  ;;  %258 = vmatpush1.msra.mxu1 %v96_v44  ;;  %v158_v4 = vld [vmem:[#allocation6 + $0x2f0] sm:$0xff]  ;;  %v935_v7 = vld [vmem:[#allocation3 + $0x8] sm:$0xff]  ;;  %v141_v10 = vld [vmem:[#allocation6 + $0x268] sm:$0xff] }
  0x40   :  { %182 = vmatprep.subr.mxu0 %v89_v45  ;;  %259 = vmatprep.subr.mxu1 %v91_v46  ;;  %v147_v8 = vld [vmem:[#allocation6 + $0x298] sm:$0xff]  ;;  %v146_v9 = vld [vmem:[#allocation6 + $0x290] sm:$0xff]  ;;  %v140_v11 = vld [vmem:[#allocation6 + $0x260] sm:$0xff] }
  0x41   :  { %183 = vmatpush1.msra.mxu0 %v88_v47  ;;  %260 = vmatpush1.msra.mxu1 %v90_v48  ;;  %v135_v12 = vld [vmem:[#allocation6 + $0x238] sm:$0xff]  ;;  %v134_v13 = vld [vmem:[#allocation6 + $0x230] sm:$0xff]  ;;  %v129_v14 = vld [vmem:[#allocation6 + $0x208] sm:$0xff] }
  0x42   :  { %184 = vmatprep.subr.mxu0 %v83_v49  ;;  %261 = vmatprep.subr.mxu1 %v85_v50  ;;  %v128_v15 = vld [vmem:[#allocation6 + $0x200] sm:$0xff]  ;;  %v123_v16 = vld [vmem:[#allocation6 + $0x1d8] sm:$0xff]  ;;  %v122_v17 = vld [vmem:[#allocation6 + $0x1d0] sm:$0xff] }
  0x43   :  { %185 = vmatpush1.msra.mxu0 %v82_v51  ;;  %262 = vmatpush1.msra.mxu1 %v84_v52  ;;  %v117_v18 = vld [vmem:[#allocation6 + $0x1a8] sm:$0xff]  ;;  %v116_v19 = vld [vmem:[#allocation6 + $0x1a0] sm:$0xff]  ;;  %v111_v20 = vld [vmem:[#allocation6 + $0x178] sm:$0xff] }
  0x44   :  { %186 = vmatprep.subr.mxu0 %v77_v53  ;;  %263 = vmatprep.subr.mxu1 %v79_v54  ;;  %v110_v21 = vld [vmem:[#allocation6 + $0x170] sm:$0xff]  ;;  %v105_v22 = vld [vmem:[#allocation6 + $0x148] sm:$0xff]  ;;  %v104_v23 = vld [vmem:[#allocation6 + $0x140] sm:$0xff] }
  0x45   :  { %187 = vmatpush1.msra.mxu0 %v76_v55  ;;  %264 = vmatpush1.msra.mxu1 %v78_v56  ;;  %v99_v24 = vld [vmem:[#allocation6 + $0x118] sm:$0xff]  ;;  %v98_v25 = vld [vmem:[#allocation6 + $0x110] sm:$0xff]  ;;  %v93_v26 = vld [vmem:[#allocation6 + $0xe8] sm:$0xff] }
  0x46   :  { %188 = vmatprep.subr.mxu0 %v71_v57  ;;  %265 = vmatprep.subr.mxu1 %v73_v58  ;;  %v92_v27 = vld [vmem:[#allocation6 + $0xe0] sm:$0xff]  ;;  %v87_v28 = vld [vmem:[#allocation6 + $0xb8] sm:$0xff]  ;;  %v86_v29 = vld [vmem:[#allocation6 + $0xb0] sm:$0xff] }
  0x47   :  { %189 = vmatpush1.msra.mxu0 %v70_v59  ;;  %266 = vmatpush1.msra.mxu1 %v72_v60  ;;  %v81_v30 = vld [vmem:[#allocation6 + $0x88] sm:$0xff]  ;;  %v80_v31 = vld [vmem:[#allocation6 + $0x80] sm:$0xff]  ;;  %v75_v32 = vld [vmem:[#allocation6 + $0x58] sm:$0xff] }
  0x48   :  { %190 = vmatprep.subr.mxu0 %v65_v61  ;;  %267 = vmatprep.subr.mxu1 %v67_v62  ;;  %v74_v33 = vld [vmem:[#allocation6 + $0x50] sm:$0xff]  ;;  %v69_v34 = vld [vmem:[#allocation6 + $0x28] sm:$0xff]  ;;  %v68_v35 = vld [vmem:[#allocation6 + $0x20] sm:$0xff] }
  0x49   :  { %191 = vmatpush1.msra.mxu0 %v64_v63  ;;  %268 = vmatpush1.msra.mxu1 %v66_v1  ;;  %v472_v36 = vld [vmem:[#allocation8 + $0xf8] sm:$0xff]  ;;  %v471_v39 = vld [vmem:[#allocation8 + $0xf0] sm:$0xff]  ;;  %v470_v42 = vld [vmem:[#allocation8 + $0xe8] sm:$0xff] }
  0x4a   :  { %225 = vmatmul.mubr.f32.vlgmr.msra.gmra.mxu0 %v930_v2  ;;  %302 = vmatmul.mubr.f32.vlgmr.msra.gmra.mxu1 %v930_v2  ;;  %v456_v37 = vld [vmem:[#allocation8 + $0x78] sm:$0xff]  ;;  %v455_v40 = vld [vmem:[#allocation8 + $0x70] sm:$0xff]  ;;  %v454_v43 = vld [vmem:[#allocation8 + $0x68] sm:$0xff] }
  0x4b   :  { %314 = vmatprep.subr.mxu0 %v159_v3  ;;  %230 = vmatprep.mubr.f32.mxu0 %v891_v0  ;;  %v488_v38 = vld [vmem:[#allocation8 + $0x178] sm:$0xff]  ;;  %v487_v41 = vld [vmem:[#allocation8 + $0x170] sm:$0xff]  ;;  %v469_v44 = vld [vmem:[#allocation8 + $0xe0] sm:$0xff] }
  0x4c   :  { %315 = vmatpush1.msra.mxu0 %v158_v4  ;;  %307 = vmatprep.mubr.f32.mxu1 %v891_v0  ;;  %v453_v45 = vld [vmem:[#allocation8 + $0x60] sm:$0xff]  ;;  %v468_v47 = vld [vmem:[#allocation8 + $0xd8] sm:$0xff]  ;;  %v467_v50 = vld [vmem:[#allocation8 + $0xd0] sm:$0xff] }
  0x4d   :  { %316 = vmatprep.subr.mxu0 %v153_v5  ;;  %674 = vmatprep.subr.mxu1 %v472_v36  ;;  %v485_v46 = vld [vmem:[#allocation8 + $0x160] sm:$0xff]  ;;  %v452_v48 = vld [vmem:[#allocation8 + $0x58] sm:$0xff]  ;;  %v451_v51 = vld [vmem:[#allocation8 + $0x50] sm:$0xff] }
  0x4e   :  { %317 = vmatpush1.msra.mxu0 %v152_v6  ;;  %308 = vmatmul.mubr.f32.gmra.mxu1 %v935_v7  ;;  %v484_v49 = vld [vmem:[#allocation8 + $0x158] sm:$0xff]  ;;  %v483_v52 = vld [vmem:[#allocation8 + $0x150] sm:$0xff]  ;;  %v466_v53 = vld [vmem:[#allocation8 + $0xc8] sm:$0xff] }
  0x4f   :  { %231 = vmatmul.mubr.f32.gmra.mxu0 %v935_v7  ;;  %318 = vmatprep.subr.mxu0 %v147_v8  ;;  %v450_v54 = vld [vmem:[#allocation8 + $0x48] sm:$0xff]  ;;  %v465_v56 = vld [vmem:[#allocation8 + $0xc0] sm:$0xff]  ;;  %v464_v59 = vld [vmem:[#allocation8 + $0xb8] sm:$0xff] }
  0x50   :  { %319 = vmatpush1.msra.mxu0 %v146_v9  ;;  %378 = vmatprep.mubr.f32.mxu0 %v891_v0  ;;  %v482_v55 = vld [vmem:[#allocation8 + $0x148] sm:$0xff]  ;;  %v449_v57 = vld [vmem:[#allocation8 + $0x40] sm:$0xff]  ;;  %v448_v60 = vld [vmem:[#allocation8 + $0x38] sm:$0xff] }
  0x51   :  { %320 = vmatprep.subr.mxu0 %v141_v10  ;;  %675 = vmatpush3.msra.mxu1 %v456_v37  ;;  %v481_v58 = vld [vmem:[#allocation8 + $0x140] sm:$0xff]  ;;  %v480_v61 = vld [vmem:[#allocation8 + $0x138] sm:$0xff]  ;;  %v463_v62 = vld [vmem:[#allocation8 + $0xb0] sm:$0xff] }
  0x52   :  { %321 = vmatpush1.msra.mxu0 %v140_v11  ;;  %676 = vmatprep.subr.mxu1 %v471_v39  ;;  %v447_v63 = vld [vmem:[#allocation8 + $0x30] sm:$0xff]  ;;  %v446_v3 = vld [vmem:[#allocation8 + $0x28] sm:$0xff]  ;;  %v461_v5 = vld [vmem:[#allocation8 + $0xa0] sm:$0xff] }
  0x53   :  { %322 = vmatprep.subr.mxu0 %v135_v12  ;;  %677 = vmatpush3.msra.mxu1 %v455_v40  ;;  %v479_v1 = vld [vmem:[#allocation8 + $0x130] sm:$0xff]  ;;  %v478_v4 = vld [vmem:[#allocation8 + $0x128] sm:$0xff]  ;;  %v445_v6 = vld [vmem:[#allocation8 + $0x20] sm:$0xff] }
  0x54   :  { %323 = vmatpush1.msra.mxu0 %v134_v13  ;;  %678 = vmatprep.subr.mxu1 %v470_v42  ;;  %v460_v8 = vld [vmem:[#allocation8 + $0x98] sm:$0xff]  ;;  %v459_v11 = vld [vmem:[#allocation8 + $0x90] sm:$0xff] }
  0x55   :  { %324 = vmatprep.subr.mxu0 %v129_v14  ;;  %679 = vmatpush3.msra.mxu1 %v454_v43  ;;  %v444_v9 = vld [vmem:[#allocation8 + $0x18] sm:$0xff]  ;;  %v443_v12 = vld [vmem:[#allocation8 + $0x10] sm:$0xff]  ;;  %v458_v14 = vld [vmem:[#allocation8 + $0x88] sm:$0xff] }
  0x56   :  { %325 = vmatpush1.msra.mxu0 %v128_v15  ;;  %680 = vmatprep.subr.mxu1 %v469_v44  ;;  %v476_v10 = vld [vmem:[#allocation8 + $0x118] sm:$0xff]  ;;  %v475_v13 = vld [vmem:[#allocation8 + $0x110] sm:$0xff]  ;;  %v442_v15 = vld [vmem:[#allocation8 + $0x8] sm:$0xff] }
  0x57   :  { %326 = vmatprep.subr.mxu0 %v123_v16  ;;  %681 = vmatpush3.msra.mxu1 %v453_v45  ;;  %v474_v16 = vld [vmem:[#allocation8 + $0x108] sm:$0xff] }
  0x58   :  { %327 = vmatpush1.msra.mxu0 %v122_v17  ;;  %682 = vmatprep.subr.mxu1 %v468_v47  ;;  %v457_v17 = vld [vmem:[#allocation8 + $0x80] sm:$0xff] }
  0x59   :  { %328 = vmatprep.subr.mxu0 %v117_v18  ;;  %683 = vmatpush3.msra.mxu1 %v452_v48  ;;  %v441_v18 = vld [vmem:[#allocation8] sm:$0xff] }
  0x5a   :  { %329 = vmatpush1.msra.mxu0 %v116_v19  ;;  %684 = vmatprep.subr.mxu1 %v467_v50  ;;  %v473_v19 = vld [vmem:[#allocation8 + $0x100] sm:$0xff] }
  0x5b   :  { %330 = vmatprep.subr.mxu0 %v111_v20  ;;  %685 = vmatpush3.msra.mxu1 %v451_v51 }
  0x5c   :  { %331 = vmatpush1.msra.mxu0 %v110_v21  ;;  %686 = vmatprep.subr.mxu1 %v466_v53 }
  0x5d   :  { %332 = vmatprep.subr.mxu0 %v105_v22  ;;  %687 = vmatpush3.msra.mxu1 %v450_v54 }
  0x5e   :  { %333 = vmatpush1.msra.mxu0 %v104_v23  ;;  %688 = vmatprep.subr.mxu1 %v465_v56 }
  0x5f   :  { %334 = vmatprep.subr.mxu0 %v99_v24  ;;  %689 = vmatpush3.msra.mxu1 %v449_v57 }
  0x60   :  { %335 = vmatpush1.msra.mxu0 %v98_v25  ;;  %690 = vmatprep.subr.mxu1 %v464_v59 }
  0x61   :  { %336 = vmatprep.subr.mxu0 %v93_v26  ;;  %691 = vmatpush3.msra.mxu1 %v448_v60 }
  0x62   :  { %337 = vmatpush1.msra.mxu0 %v92_v27  ;;  %692 = vmatprep.subr.mxu1 %v463_v62 }
  0x63   :  { %338 = vmatprep.subr.mxu0 %v87_v28  ;;  %693 = vmatpush3.msra.mxu1 %v447_v63 }
  0x64   :  { %339 = vmatpush1.msra.mxu0 %v86_v29 }
  0x65   :  { %340 = vmatprep.subr.mxu0 %v81_v30 }
  0x66   :  { %341 = vmatpush1.msra.mxu0 %v80_v31 }
  0x67   :  { %342 = vmatprep.subr.mxu0 %v75_v32 }
  0x68   :  { %343 = vmatpush1.msra.mxu0 %v74_v33 }
  0x69   :  { %344 = vmatprep.subr.mxu0 %v69_v34 }
  0x6a   :  { %345 = vmatpush1.msra.mxu0 %v68_v35 }
  0x6b   :  { %379 = vmatmul.mubr.f32.vlgmr.msra.gmra.mxu0 %v930_v2  ;;  %730 = vmatprep.subr.mxu0 %v488_v38  ;;  %v462_v2 = vld [vmem:[#allocation8 + $0xa8] sm:$0xff] }
  0x6c   :  { %384 = vmatprep.mubr.f32.mxu0 %v891_v0  ;;  %731 = vmatpush3.msra.mxu0 %v488_v38  ;;  %v486_v0 = vld [vmem:[#allocation8 + $0x168] sm:$0xff] }
  0x6d   :  { %732 = vmatprep.subr.mxu0 %v487_v41  ;;  %694 = vmatprep.subr.mxu1 %v462_v2 }
  0x6e   :  { %733 = vmatpush3.msra.mxu0 %v487_v41  ;;  %695 = vmatpush3.msra.mxu1 %v446_v3 }
  0x6f   :  { %385 = vmatmul.mubr.f32.gmra.mxu0 %v935_v7  ;;  %734 = vmatprep.subr.mxu0 %v486_v0  ;;  %v477_v7 = vld [vmem:[#allocation8 + $0x120] sm:$0xff] }
  0x70   :  { %735 = vmatpush3.msra.mxu0 %v486_v0  ;;  %696 = vmatprep.subr.mxu1 %v461_v5 }
  0x71   :  { %736 = vmatprep.subr.mxu0 %v485_v46  ;;  %697 = vmatpush3.msra.mxu1 %v445_v6 }
  0x72   :  { %737 = vmatpush3.msra.mxu0 %v485_v46  ;;  %698 = vmatprep.subr.mxu1 %v460_v8 }
  0x73   :  { %738 = vmatprep.subr.mxu0 %v484_v49  ;;  %699 = vmatpush3.msra.mxu1 %v444_v9 }
  0x74   :  { %739 = vmatpush3.msra.mxu0 %v484_v49  ;;  %700 = vmatprep.subr.mxu1 %v459_v11 }
  0x75   :  { %740 = vmatprep.subr.mxu0 %v483_v52  ;;  %701 = vmatpush3.msra.mxu1 %v443_v12 }
  0x76   :  { %741 = vmatpush3.msra.mxu0 %v483_v52  ;;  %702 = vmatprep.subr.mxu1 %v458_v14 }
  0x77   :  { %742 = vmatprep.subr.mxu0 %v482_v55  ;;  %703 = vmatpush3.msra.mxu1 %v442_v15 }
  0x78   :  { %743 = vmatpush3.msra.mxu0 %v482_v55  ;;  %704 = vmatprep.subr.mxu1 %v457_v17 }
  0x79   :  { %744 = vmatprep.subr.mxu0 %v481_v58  ;;  %705 = vmatpush3.msra.mxu1 %v441_v18 }
  0x7a   :  { %745 = vmatpush3.msra.mxu0 %v481_v58 }
  0x7b   :  { %746 = vmatprep.subr.mxu0 %v480_v61 }
  0x7c   :  { %747 = vmatpush3.msra.mxu0 %v480_v61 }
  0x7d   :  { %748 = vmatprep.subr.mxu0 %v479_v1 }
  0x7e   :  { %749 = vmatpush3.msra.mxu0 %v479_v1 }
  0x7f   :  { %750 = vmatprep.subr.mxu0 %v478_v4 }
  0x80   :  { %751 = vmatpush3.msra.mxu0 %v478_v4 }
  0x81   :  { %752 = vmatprep.subr.mxu0 %v477_v7 }
  0x82   :  { %753 = vmatpush3.msra.mxu0 %v477_v7 }
  0x83   :  { %754 = vmatprep.subr.mxu0 %v476_v10 }
  0x84   :  { %755 = vmatpush3.msra.mxu0 %v476_v10 }
  0x85   :  { %756 = vmatprep.subr.mxu0 %v475_v13 }
  0x86   :  { %757 = vmatpush3.msra.mxu0 %v475_v13 }
  0x87   :  { %758 = vmatprep.subr.mxu0 %v474_v16 }
  0x88   :  { %759 = vmatpush3.msra.mxu0 %v474_v16 }
  0x89   :  { %760 = vmatprep.subr.mxu0 %v473_v19 }
  0x8a   :  { %761 = vmatpush3.msra.mxu0 %v473_v19 }
 0x10a   :  { %v226_v20 = vpop.f32.mrf.mxu0  ;;  %v303_v21 = vpop.f32.mrf.mxu1 }
 0x10b   :  { %v668_v22 = vmul.f32 -1.442695, %v226_v20  ;;  %v670_v23 = vmul.f32 -1.442695, %v303_v21 }
 0x10c   :  { %v228_v24 = vpop.f32.mrf.mxu0  ;;  %v305_v25 = vpop.f32.mrf.mxu1 }
 0x10d   :  { %774 = vpow2.f32 %v668_v22  ;;  %v669_v26 = vmul.f32 -1.442695, %v228_v24 }
 0x10e   :  { %776 = vpow2.f32 %v670_v23  ;;  %v309_v27 = vpop.f32.mrf.mxu1 }
 0x10f   :  { %778 = vpow2.f32 %v669_v26  ;;  %v232_v28 = vpop.f32.mrf.mxu0  ;;  %v673_v29 = vmul.f32 -1.442695, %v309_v27 }
 0x110   :  { %v671_v30 = vmul.f32 -1.442695, %v232_v28  ;;  %v311_v1 = vpop.f32.mrf.mxu1 }
 0x111   :  { %780 = vpow2.f32 %v673_v29  ;;  %v234_v31 = vpop.f32.mrf.mxu0 }
 0x112   :  { %782 = vpow2.f32 %v671_v30  ;;  %v672_v32 = vmul.f32 -1.442695, %v234_v31 }
 0x114   :  { %784 = vpow2.f32 %v672_v32 }
 0x11a   :  { %v775_v33 = vpop.eup %774 }
 0x11b   :  { %v777_v34 = vpop.eup %776  ;;  %v409_v35 = vadd.f32 1.0, %v775_v33 }
 0x11c   :  { %v779_v36 = vpop.eup %778  ;;  %v411_v37 = vadd.f32 1.0, %v777_v34 }
 0x11d   :  { %786 = vrcp.f32 %v409_v35  ;;  %v410_v38 = vadd.f32 1.0, %v779_v36 }
 0x11e   :  { %v781_v39 = vpop.eup %780  ;;  %788 = vrcp.f32 %v411_v37 }
 0x11f   :  { %v783_v40 = vpop.eup %782  ;;  %790 = vrcp.f32 %v410_v38  ;;  %v414_v41 = vadd.f32 1.0, %v781_v39 }
 0x120   :  { %v412_v42 = vadd.f32 1.0, %v783_v40 }
 0x121   :  { %v785_v43 = vpop.eup %784  ;;  %792 = vrcp.f32 %v414_v41 }
 0x122   :  { %794 = vrcp.f32 %v412_v42  ;;  %v413_v0 = vadd.f32 1.0, %v785_v43 }
 0x124   :  { %796 = vrcp.f32 %v413_v0 }
 0x12a   :  { %v787_v44 = vpop.eup %786 }
 0x12b   :  { %v789_v45 = vpop.eup %788  ;;  %v380_v46 = vpop.f32.mrf.mxu0  ;;  %v427_v48 = vmul.f32 %v787_v44, %v226_v20 }
 0x12c   :  { %v791_v47 = vpop.eup %790  ;;  %v429_v49 = vmul.f32 %v789_v45, %v303_v21 }
 0x12d   :  { %v428_v50 = vmul.f32 %v791_v47, %v228_v24  ;;  %v382_v51 = vpop.f32.mrf.mxu0  ;;  %v433_v58 = vmul.f32 %v427_v48, %v305_v25 }
 0x12e   :  { %v793_v52 = vpop.eup %792  ;;  %v435_v53 = vmul.f32 %v429_v49, %v382_v51 }
 0x12f   :  { %v795_v54 = vpop.eup %794  ;;  %v432_v55 = vmul.f32 %v793_v52, %v309_v27  ;;  %v434_v56 = vmul.f32 %v428_v50, %v380_v46  ;;  %v386_v57 = vpop.f32.mrf.mxu0 }
 0x130   :  { %762 = vmatprep.mubr.f32.mxu0 %v435_v53  ;;  %v430_v60 = vmul.f32 %v795_v54, %v232_v28 }
 0x131   :  { %v797_v59 = vpop.eup %796  ;;  %v388_v61 = vpop.f32.mrf.mxu0  ;;  %553 = vmatprep.mubr.f32.mxu1 %v434_v56 }
 0x132   :  { %v431_v62 = vmul.f32 %v797_v59, %v234_v31  ;;  %v438_v63 = vmul.f32 %v432_v55, %v388_v61  ;;  %554 = vmatmul.mubr.f32.vlgmr.msra.gmra.mxu1 %v433_v58  ;;  %v436_v3 = vmul.f32 %v430_v60, %v311_v1 }
 0x134   :  { %v437_v2 = vmul.f32 %v431_v62, %v386_v57  ;;  %763 = vmatmul.mubr.f32.vlgmr.msra.gmra.mxu0 %v438_v63 }
 0x136   :  { %558 = vmatprep.mubr.f32.mxu1 %v437_v2 }
 0x137   :  { %559 = vmatmul.mubr.f32.gmra.mxu1 %v436_v3 }
 0x1f2   :  { %v706_v4 = vpop.f32.mrf.mxu1 }
 0x1f4   :  { %v764_v5 = vpop.f32.mrf.mxu0  ;;  %v707_v6 = vpop.f32.mrf.mxu1 }
 0x1f5   :  { %v708_v7 = vadd.f32 %v707_v6, %v706_v4 }
 0x1f6   :  { %v630_v8 = vpop.f32.mrf.mxu0 }
 0x1f7   :  { %v631_v9 = vadd.f32 %v708_v7, %v630_v8  ;;  %v709_v10 = vpop.f32.mrf.mxu1 }
 0x1f9   :  { %648 = vst [vmem:[#allocation9] sm:$0xff] %v631_v9  ;;  %v710_v11 = vpop.f32.mrf.mxu1 }
 0x1fa   :  { %v711_v12 = vadd.f32 %v710_v11, %v709_v10 }
 0x1fc   :  { %v636_v13 = vadd.f32 %v764_v5, %v711_v12 }
 0x1fe   :  { %649 = vst [vmem:[#allocation9 + $0x8] sm:$0xff] %v636_v13 }
 0x1ff   :  { %869 = shalt.err (!%p866_p5)
}
 0x200   :  { %661 = dma.vmem_to_hbm [thread:$0]  %s656_s2, 256, %s953_s3, [#allocation5], %s888_s22, %s888_s22, %s889_s23  }
 0x201   :  { %882 = dma.done.wait [#allocation5], 256  }
 0x202   :  { %883 = vsyncadd [#allocation5], 4294967040 }
 0x203   :  { %665 = vsyncpa [#allocation4], 1 }
 0x204   :  { %666 = vsyncpa [#allocation7], 1 }
 0x205   :  { %667 = vsyncpa [#allocation5], 1 }

</bundles_post_ra>
